<compile_context>
chip_gen: v7x
topology: tpu7x:2x2x1
jax: 0.10.0
libtpu: 0.0.40
codegen_flags: <defaults>
</compile_context>

<pallas_src>
import functools
import math

import jax
import jax.numpy as jnp
from jax.experimental import pallas as pl
from jax.experimental.pallas import tpu as pltpu


def _round_up(x, m):
    return ((x + m - 1) // m) * m


def _device_vmem_bytes():
    """Per-TensorCore VMEM capacity; conservative (v7x) fallback."""
    try:
        info = pltpu.get_tpu_info()
        cap = int(getattr(info, "vmem_capacity_bytes", 0))
        if cap > 0:
            return cap
    except Exception:
        pass
    return 64 * 1024 * 1024


# ---------------------------------------------------------------------------
# Kernel: per-(split, batch) streaming reduction over voxel chunks.
#   grid = (n_split, B, chunks_per_split)      ("parallel","parallel","arbitrary")
#   pred_ref / ref_ref : (1, C, chunk_vox) VMEM tiles (class axis = full dim)
#   inter/psum/rsum    : (1, 1, C, 1) f32 output blocks, resident across the
#                        chunk axis (output-as-accumulator pattern).
# ---------------------------------------------------------------------------
def _dice_partial_kernel(pred_ref, ref_ref, inter_ref, psum_ref, rsum_ref, *,
                         cps, chunk_vox, nvox, needs_mask):
    s = pl.program_id(0)          # core-split index
    j = pl.program_id(2)          # chunk index within this split

    @pl.when(j == 0)
    def _():
        inter_ref[...] = jnp.zeros_like(inter_ref)
        psum_ref[...] = jnp.zeros_like(psum_ref)
        rsum_ref[...] = jnp.zeros_like(rsum_ref)

    # Upcast in-kernel (supports bf16 pred / narrow ref without an extra HBM pass).
    p = pred_ref[0].astype(jnp.float32)   # (C, chunk_vox)
    r = ref_ref[0].astype(jnp.float32)    # (C, chunk_vox)

    def accum(pv, rv):
        # Pure VPU element-wise products + per-class row reduction (no MXU).
        inter_ref[...] += jnp.sum(pv * rv, axis=-1, keepdims=True)[None, None]
        psum_ref[...] += jnp.sum(pv * pv, axis=-1, keepdims=True)[None, None]   # square=True
        rsum_ref[...] += jnp.sum(rv * rv, axis=-1, keepdims=True)[None, None]

    if needs_mask:
        off = (s * cps + j) * chunk_vox          # global voxel offset (unclamped)
        is_partial = (off + chunk_vox) > nvox

        @pl.when(jnp.logical_not(is_partial))
        def _():
            accum(p, r)

        @pl.when(is_partial)
        def _():
            # Mask the ragged tail (and fully out-of-range re-read blocks).
            idx = jax.lax.broadcasted_iota(jnp.int32, p.shape, 1)
            valid = (idx + off) < nvox
            accum(jnp.where(valid, p, 0.0), jnp.where(valid, r, 0.0))
    else:
        accum(p, r)


# ---------------------------------------------------------------------------
# Wrapper
# ---------------------------------------------------------------------------
def dice_loss(pred, ref, *, block_bytes=4 * 1024 * 1024, max_chunk_vox=None):
    """Equivalent to DiceLoss()(pred, ref) with default options
    (square=True, weighted=False, eps=None -> nvox/K, reduction='mean',
    activation=None, mask=None, floating-point one-hot/expectation reference).
    """
    if pred.shape != ref.shape:
        raise NotImplementedError(
            "only the one-hot (matching-shape) reference path is kernelized")
    B, C = int(pred.shape[0]), int(pred.shape[1])
    nvox = int(math.prod(pred.shape[2:]))

    isize_p = jnp.dtype(pred.dtype).itemsize
    isize_r = jnp.dtype(ref.dtype).itemsize

    # Free, contiguous views -- no pad, no copy.
    pred_f = pred.reshape(B, C, nvox)
    ref_f = ref.reshape(B, C, nvox)

    # ---- chunk sizing (per-generation VMEM aware) ---------------------------
    vmem_cap = _device_vmem_bytes()
    budget = min((vmem_cap * 3) // 4, 96 * 1024 * 1024)      # headroom below cap
    per_vox_bytes = C * (isize_p + isize_r)                   # HBM bytes per voxel
    chunk_cap = max(128, ((budget - (2 << 20)) // (2 * per_vox_bytes)) // 128 * 128)
    target = max(128, (block_bytes // (C * isize_p)) // 128 * 128)
    floor = 256 * 128                                          # keep DMA runs long for large C
    chunk_vox = min(max(target, floor), chunk_cap, _round_up(nvox, 128))
    if max_chunk_vox is not None:
        chunk_vox = min(chunk_vox, max(128, (max_chunk_vox // 128) * 128))
    chunk_vox = max(128, (chunk_vox // 128) * 128)

    n_chunks = pl.cdiv(nvox, chunk_vox)
    # Megacore (v7x, 2 TCs): when B == 1, split the chunk axis 2-way so both
    # cores work.  Harmless (sequential) on single-core chips.
    n_split = 2 if (B == 1 and n_chunks >= 2) else 1
    cps = pl.cdiv(n_chunks, n_split)                           # chunks per split
    needs_mask = (n_split * cps * chunk_vox) != nvox

    last_block = n_chunks - 1

    def in_map(s, b, j):
        # Clamp fully out-of-range blocks to a valid one; the kernel masks them
        # to zero based on the *unclamped* offset.
        jg = jnp.minimum(s * cps + j, last_block)
        return (b, 0, jg)

    def out_map(s, b, j):
        return (s, b, 0, 0)

    step_in_bytes = chunk_vox * per_vox_bytes
    vmem_limit = int(max(32 << 20,
                         min(2 * step_in_bytes + (8 << 20), vmem_cap - (4 << 20))))

    cost = pl.CostEstimate(
        flops=6 * B * C * nvox,                     # 3 mul + 3 add per voxel/class
        transcendentals=0,
        bytes_accessed=B * C * nvox * (isize_p + isize_r))

    kernel = functools.partial(
        _dice_partial_kernel, cps=cps, chunk_vox=chunk_vox, nvox=nvox,
        needs_mask=needs_mask)

    part_shape = jax.ShapeDtypeStruct((n_split, B, C, 1), jnp.float32)
    part_spec = pl.BlockSpec((1, 1, C, 1), out_map)
    in_spec = pl.BlockSpec((1, C, chunk_vox), in_map)

    inter_p, psum_p, rsum_p = pl.pallas_call(
        kernel,
        out_shape=(part_shape, part_shape, part_shape),
        grid=(n_split, B, cps),
        in_specs=[in_spec, in_spec],
        out_specs=(part_spec, part_spec, part_spec),
        compiler_params=pltpu.CompilerParams(
            dimension_semantics=("parallel", "parallel", "arbitrary"),
            vmem_limit_bytes=vmem_limit),
        cost_estimate=cost,
    )(pred_f, ref_f)

    # ---- tiny epilogue in plain JAX (dice, eps, class mean, batch mean) -----
    inter = jnp.sum(inter_p[..., 0], axis=0)                   # (B, C)
    union = jnp.sum(psum_p[..., 0], axis=0) + jnp.sum(rsum_p[..., 0], axis=0)
    eps = float(nvox) / float(C)                               # eps=1/K, then *= nvox
    dice = (2.0 * inter + eps) / (union + eps)
    loss_b = 1.0 - jnp.mean(dice, axis=-1)                     # weighted=False
    return jnp.mean(loss_b).astype(pred.dtype)                 # reduction='mean'


# TODO(synk): integer-label-map path (forward_labels), the optional mask,
# weighted=True / per-class weights, and custom activation are not kernelized;
# only the default one-hot floating-point path is implemented.


def _dice_loss_ref(pred, ref):
    """Pure-JAX reference replicating forward_onehot with default options."""
    B, C = pred.shape[:2]
    nvox = int(math.prod(pred.shape[2:]))
    eps = nvox / C
    p = pred.reshape(B, C, -1).astype(jnp.float32)
    r = ref.reshape(B, C, -1).astype(jnp.float32)
    inter = jnp.sum(p * r, axis=-1)
    union = jnp.sum(p * p, axis=-1) + jnp.sum(r * r, axis=-1)
    dice = (2.0 * inter + eps) / (union + eps)
    return jnp.mean(1.0 - jnp.mean(dice, axis=-1))


if __name__ == "__main__":
    key = jax.random.PRNGKey(0)
    ks = jax.random.split(key, 6)

    def make(k1, k2, B, C, spatial):
        logits = jax.random.normal(k1, (B, C) + spatial, dtype=jnp.float32)
        pred = jax.nn.softmax(logits, axis=1)
        labels = jax.random.randint(k2, (B, 1) + spatial, 0, C)
        onehot = (labels == jnp.arange(C).reshape((1, C) + (1,) * len(spatial)))
        return pred, onehot.astype(jnp.float32)

    # 1) small, 128-aligned volume, single chunk
    pred, ref = make(ks[0], ks[1], 2, 4, (16, 16))
    out = jax.block_until_ready(dice_loss(pred, ref))
    want = jax.block_until_ready(_dice_loss_ref(pred, ref))
    assert jnp.allclose(out, want, rtol=1e-5, atol=1e-5), (out, want)

    # 2) unaligned voxel count (19*23=437) forced through multi-chunk streaming
    #    -> exercises the in-kernel ragged-tail masking (no host pad)
    pred2, ref2 = make(ks[2], ks[3], 2, 3, (19, 23))
    out2 = jax.block_until_ready(dice_loss(pred2, ref2, max_chunk_vox=128))
    want2 = jax.block_until_ready(_dice_loss_ref(pred2, ref2))
    assert jnp.allclose(out2, want2, rtol=1e-5, atol=1e-5), (out2, want2)

    # 3) B == 1 -> 2-way core split over the chunk axis (megacore path),
    #    with a chunk size that forces clamped + partial blocks
    pred3, ref3 = make(ks[4], ks[5], 1, 4, (32, 32))
    out3 = jax.block_until_ready(dice_loss(pred3, ref3, max_chunk_vox=384))
    want3 = jax.block_until_ready(_dice_loss_ref(pred3, ref3))
    assert jnp.allclose(out3, want3, rtol=1e-5, atol=1e-5), (out3, want3)

    print("KERNEL_OK")
</pallas_src>

<mosaic_0001>
module attributes {stable_mosaic.version = 11 : i64} {
  func.func @_dice_partial_kernel(%arg0: i32, %arg1: i32, %arg2: i32, %arg3: memref<1x4x256xf32, #tpu.memory_space<vmem>>, %arg4: memref<1x4x256xf32, #tpu.memory_space<vmem>>, %arg5: memref<1x1x4x1xf32, #tpu.memory_space<vmem>>, %arg6: memref<1x1x4x1xf32, #tpu.memory_space<vmem>>, %arg7: memref<1x1x4x1xf32, #tpu.memory_space<vmem>>) attributes {dimension_semantics = [#tpu.dimension_semantics<parallel>, #tpu.dimension_semantics<parallel>, #tpu.dimension_semantics<arbitrary>], iteration_bounds = array<i64: 1, 2, 1>, scalar_prefetch = 0 : i64, scratch_operands = 0 : i64, tpu.core_type = #tpu.core_type<tc>, window_params = [{transform_indices = @transform_0, window_bounds = array<i64: 1, 4, 256>}, {transform_indices = @transform_1, window_bounds = array<i64: 1, 4, 256>}, {transform_indices = @transform_2, window_bounds = array<i64: 1, 1, 4, 1>}, {transform_indices = @transform_3, window_bounds = array<i64: 1, 1, 4, 1>}, {transform_indices = @transform_4, window_bounds = array<i64: 1, 1, 4, 1>}]} {
    %c0_i32 = arith.constant 0 : i32
    %0 = arith.cmpi eq, %arg2, %c0_i32 : i32
    %1 = arith.extui %0 : i1 to i32
    %c0_i32_0 = arith.constant 0 : i32
    %2 = arith.cmpi ne, %1, %c0_i32_0 : i32
    scf.if %2 {
      %cst_32 = arith.constant 0.000000e+00 : f32
      %28 = vector.broadcast %cst_32 : f32 to vector<1x1x4x1xf32>
      %c0_33 = arith.constant 0 : index
      %c0_34 = arith.constant 0 : index
      %c0_35 = arith.constant 0 : index
      %c0_36 = arith.constant 0 : index
      %29 = vector.load %arg5[%c0_33, %c0_34, %c0_35, %c0_36] : memref<1x1x4x1xf32, #tpu.memory_space<vmem>>, vector<1x1x4x1xf32>
      tpu.vector_store %arg5[%c0_33, %c0_34, %c0_35, %c0_36], %28 {strides = array<i32>} : memref<1x1x4x1xf32, #tpu.memory_space<vmem>>, vector<1x1x4x1xf32>,
      %cst_37 = arith.constant 0.000000e+00 : f32
      %30 = vector.broadcast %cst_37 : f32 to vector<1x1x4x1xf32>
      %c0_38 = arith.constant 0 : index
      %c0_39 = arith.constant 0 : index
      %c0_40 = arith.constant 0 : index
      %c0_41 = arith.constant 0 : index
      %31 = vector.load %arg6[%c0_38, %c0_39, %c0_40, %c0_41] : memref<1x1x4x1xf32, #tpu.memory_space<vmem>>, vector<1x1x4x1xf32>
      tpu.vector_store %arg6[%c0_38, %c0_39, %c0_40, %c0_41], %30 {strides = array<i32>} : memref<1x1x4x1xf32, #tpu.memory_space<vmem>>, vector<1x1x4x1xf32>,
      %cst_42 = arith.constant 0.000000e+00 : f32
      %32 = vector.broadcast %cst_42 : f32 to vector<1x1x4x1xf32>
      %c0_43 = arith.constant 0 : index
      %c0_44 = arith.constant 0 : index
      %c0_45 = arith.constant 0 : index
      %c0_46 = arith.constant 0 : index
      %33 = vector.load %arg7[%c0_43, %c0_44, %c0_45, %c0_46] : memref<1x1x4x1xf32, #tpu.memory_space<vmem>>, vector<1x1x4x1xf32>
      tpu.vector_store %arg7[%c0_43, %c0_44, %c0_45, %c0_46], %32 {strides = array<i32>} : memref<1x1x4x1xf32, #tpu.memory_space<vmem>>, vector<1x1x4x1xf32>,
    } else {
    }
    %c0 = arith.constant 0 : index
    %c0_1 = arith.constant 0 : index
    %c0_2 = arith.constant 0 : index
    %3 = vector.load %arg3[%c0, %c0_1, %c0_2] : memref<1x4x256xf32, #tpu.memory_space<vmem>>, vector<1x4x256xf32>
    %4 = vector.shape_cast %3 : vector<1x4x256xf32> to vector<4x256xf32>
    %c0_3 = arith.constant 0 : index
    %c0_4 = arith.constant 0 : index
    %c0_5 = arith.constant 0 : index
    %5 = vector.load %arg4[%c0_3, %c0_4, %c0_5] : memref<1x4x256xf32, #tpu.memory_space<vmem>>, vector<1x4x256xf32>
    %6 = vector.shape_cast %5 : vector<1x4x256xf32> to vector<4x256xf32>
    %c0_6 = arith.constant 0 : index
    %c0_7 = arith.constant 0 : index
    %c0_8 = arith.constant 0 : index
    %c0_9 = arith.constant 0 : index
    %7 = vector.load %arg5[%c0_6, %c0_7, %c0_8, %c0_9] : memref<1x1x4x1xf32, #tpu.memory_space<vmem>>, vector<1x1x4x1xf32>
    %8 = arith.mulf %4, %6 : vector<4x256xf32>
    %cst = arith.constant dense<0.000000e+00> : vector<4xf32>
    %9 = vector.multi_reduction <add>, %8, %cst [1] : vector<4x256xf32> to vector<4xf32>
    %10 = vector.shape_cast %9 : vector<4xf32> to vector<4x1xf32>
    %11 = vector.shape_cast %10 : vector<4x1xf32> to vector<1x1x4x1xf32>
    %12 = arith.addf %7, %11 : vector<1x1x4x1xf32>
    %c0_10 = arith.constant 0 : index
    %c0_11 = arith.constant 0 : index
    %c0_12 = arith.constant 0 : index
    %c0_13 = arith.constant 0 : index
    %13 = vector.load %arg5[%c0_10, %c0_11, %c0_12, %c0_13] : memref<1x1x4x1xf32, #tpu.memory_space<vmem>>, vector<1x1x4x1xf32>
    tpu.vector_store %arg5[%c0_10, %c0_11, %c0_12, %c0_13], %12 {strides = array<i32>} : memref<1x1x4x1xf32, #tpu.memory_space<vmem>>, vector<1x1x4x1xf32>,
    %c0_14 = arith.constant 0 : index
    %c0_15 = arith.constant 0 : index
    %c0_16 = arith.constant 0 : index
    %c0_17 = arith.constant 0 : index
    %14 = vector.load %arg6[%c0_14, %c0_15, %c0_16, %c0_17] : memref<1x1x4x1xf32, #tpu.memory_space<vmem>>, vector<1x1x4x1xf32>
    %15 = arith.mulf %4, %4 : vector<4x256xf32>
    %cst_18 = arith.constant dense<0.000000e+00> : vector<4xf32>
    %16 = vector.multi_reduction <add>, %15, %cst_18 [1] : vector<4x256xf32> to vector<4xf32>
    %17 = vector.shape_cast %16 : vector<4xf32> to vector<4x1xf32>
    %18 = vector.shape_cast %17 : vector<4x1xf32> to vector<1x1x4x1xf32>
    %19 = arith.addf %14, %18 : vector<1x1x4x1xf32>
    %c0_19 = arith.constant 0 : index
    %c0_20 = arith.constant 0 : index
    %c0_21 = arith.constant 0 : index
    %c0_22 = arith.constant 0 : index
    %20 = vector.load %arg6[%c0_19, %c0_20, %c0_21, %c0_22] : memref<1x1x4x1xf32, #tpu.memory_space<vmem>>, vector<1x1x4x1xf32>
    tpu.vector_store %arg6[%c0_19, %c0_20, %c0_21, %c0_22], %19 {strides = array<i32>} : memref<1x1x4x1xf32, #tpu.memory_space<vmem>>, vector<1x1x4x1xf32>,
    %c0_23 = arith.constant 0 : index
    %c0_24 = arith.constant 0 : index
    %c0_25 = arith.constant 0 : index
    %c0_26 = arith.constant 0 : index
    %21 = vector.load %arg7[%c0_23, %c0_24, %c0_25, %c0_26] : memref<1x1x4x1xf32, #tpu.memory_space<vmem>>, vector<1x1x4x1xf32>
    %22 = arith.mulf %6, %6 : vector<4x256xf32>
    %cst_27 = arith.constant dense<0.000000e+00> : vector<4xf32>
    %23 = vector.multi_reduction <add>, %22, %cst_27 [1] : vector<4x256xf32> to vector<4xf32>
    %24 = vector.shape_cast %23 : vector<4xf32> to vector<4x1xf32>
    %25 = vector.shape_cast %24 : vector<4x1xf32> to vector<1x1x4x1xf32>
    %26 = arith.addf %21, %25 : vector<1x1x4x1xf32>
    %c0_28 = arith.constant 0 : index
    %c0_29 = arith.constant 0 : index
    %c0_30 = arith.constant 0 : index
    %c0_31 = arith.constant 0 : index
    %27 = vector.load %arg7[%c0_28, %c0_29, %c0_30, %c0_31] : memref<1x1x4x1xf32, #tpu.memory_space<vmem>>, vector<1x1x4x1xf32>
    tpu.vector_store %arg7[%c0_28, %c0_29, %c0_30, %c0_31], %26 {strides = array<i32>} : memref<1x1x4x1xf32, #tpu.memory_space<vmem>>, vector<1x1x4x1xf32>,
    return
  }
  func.func @transform_0(%arg0: i32, %arg1: i32, %arg2: i32) -> (i32, i32, i32) {
    %c1_i32 = arith.constant 1 : i32
    %0 = arith.muli %arg0, %c1_i32 : i32
    %1 = arith.addi %0, %arg2 : i32
    %c0_i32 = arith.constant 0 : i32
    %2 = arith.minsi %1, %c0_i32 : i32
    %c0_i32_0 = arith.constant 0 : i32
    %c0_i32_1 = arith.constant 0 : i32
    return %arg1, %c0_i32_0, %2 : i32, i32, i32
  }
  func.func @transform_1(%arg0: i32, %arg1: i32, %arg2: i32) -> (i32, i32, i32) {
    %c1_i32 = arith.constant 1 : i32
    %0 = arith.muli %arg0, %c1_i32 : i32
    %1 = arith.addi %0, %arg2 : i32
    %c0_i32 = arith.constant 0 : i32
    %2 = arith.minsi %1, %c0_i32 : i32
    %c0_i32_0 = arith.constant 0 : i32
    %c0_i32_1 = arith.constant 0 : i32
    return %arg1, %c0_i32_0, %2 : i32, i32, i32
  }
  func.func @transform_2(%arg0: i32, %arg1: i32, %arg2: i32) -> (i32, i32, i32, i32) {
    %c0_i32 = arith.constant 0 : i32
    %c0_i32_0 = arith.constant 0 : i32
    %c0_i32_1 = arith.constant 0 : i32
    return %arg0, %arg1, %c0_i32, %c0_i32_0 : i32, i32, i32, i32
  }
  func.func @transform_3(%arg0: i32, %arg1: i32, %arg2: i32) -> (i32, i32, i32, i32) {
    %c0_i32 = arith.constant 0 : i32
    %c0_i32_0 = arith.constant 0 : i32
    %c0_i32_1 = arith.constant 0 : i32
    return %arg0, %arg1, %c0_i32, %c0_i32_0 : i32, i32, i32, i32
  }
  func.func @transform_4(%arg0: i32, %arg1: i32, %arg2: i32) -> (i32, i32, i32, i32) {
    %c0_i32 = arith.constant 0 : i32
    %c0_i32_0 = arith.constant 0 : i32
    %c0_i32_1 = arith.constant 0 : i32
    return %arg0, %arg1, %c0_i32, %c0_i32_0 : i32, i32, i32, i32
  }
}

</mosaic_0001>

<bundles_post_ra>
// kernel: tpu_custom_call.1
= control target key start
LH: loop header
LB: loop body
LE: loop exit
PB: predicated region body
PF: predicated region fallthrough
CT: control target
= control target key end

     0   :  { %10 = vsyncpa [#allocation3], 0  ;;  %s1033_s0 = inlined_call_operand.hbm [shape: f32[2,4,256], index: 0, kind: input, shape index: {}]   ;;  %s1034_s1 = inlined_call_operand.hbm [shape: f32[2,4,256], index: 1, kind: input, shape index: {}]   ;;  %s1035_s2 = inlined_call_operand.vmem [shape: f32[1,2,4,1], index: 2, kind: output, shape index: {0}]   ;;  %s1036_s3 = inlined_call_operand.vmem [shape: f32[1,2,4,1], index: 3, kind: output, shape index: {1}]   ;;  %s1037_s4 = inlined_call_operand.vmem [shape: f32[1,2,4,1], index: 4, kind: output, shape index: {2}]  }
   0x1   :  { %12 = vsyncpa [#allocation3 + $0x1], 0 }
   0x2   :  { %13 = vsyncpa [#allocation5], 0 }
   0x3   :  { %15 = vsyncpa [#allocation5 + $0x1], 0  ;;  %s844_s15 = smov 0   ;;  %s846_s16 = smov 0  }
   0x4   :  { %s848_s17 = smov 0   ;;  %s850_s18 = smov 0  }
   0x5   :  { %s852_s19 = smov 0   ;;  %s854_s20 = smov 0  }
   0x6 LB: > { %s619_s21 = sadd.s32 4294967295, %s814_s20   ;;  %s36_s22 = sadd.s32 1, %s810_s19  ;;  %s814_s20 = sphi %s854_s20, %s21_s20   ;;  %s810_s19 = sphi %s852_s19, %s1051_s19   ;;  %s806_s18 = sphi %s850_s18, %s1050_s18   ;;  %s802_s17 = sphi %s848_s17, %s1049_s17   ;;  %s798_s16 = sphi %s846_s16, %s1048_s16   ;;  %s794_s15 = sphi %s844_s15, %s1047_s15  }
   0x7   : > { %p38_p0 = scmp.ge.s32.totalorder %s36_s22, 2  ;;  %s55_s23 = sadd.s32 1, %s802_s17 }
   0x8   : > { %p62_p1 = scmp.ne.s32.totalorder %s802_s17, %s798_s16  ;;  %p63_p2 = scmp.eq.s32.totalorder %s814_s20, 0 }
   0x9   : > { %s1053_s22 = smov (%p38_p0, %s36_s22), 0  ;;  %p68_p4 = scmp.ne.s32.totalorder %s798_s16, %s794_s15 }
   0xa   : > { %p880_p3 = por %p63_p2, %p62_p1  ;;  %s50_s25 = ssub.s32 %s810_s19, %s1053_s22 }
   0xb   : > { %p69_p5 = scmp.eq.s32.totalorder %s619_s21, 0  ;;  %p53_p6 = scmp.eq.s32.totalorder %s50_s25, 0 }
   0xc   : > { %p650_p8 = scmp.lt.s32.totalorder %s814_s20, 2  ;;  %s896_s28 = sand.u32 1, %s802_s17  }
   0xd   : > { %p887_p7 = por %p69_p5, %p68_p4  ;;  %s637_s29 = sshll.u32 %s810_s19, 7 }
   0xe   : > { %s893_s27 = scalar_select %p53_p6, %s802_s17, %s55_s23  }
   0xf   : > { %s1040_s26 = scalar_select %p887_p7, 1, 0 }
  0x10   : > { %s623_s30 = sshll.u32 %s896_s28, 3  ;;  %s905_s7 = scalar_lea.hbm %s1033_s0, %s637_s29 }
  0x11   : > { %s214_s8 = scalar_lea.vmem [#allocation2], %s623_s30  ;;  %p911_p9 = pnand %p650_p8, %p880_p3 }
  0x12   : > { %s227_s9 = sshll.u32 %s214_s8, 4  ;;  %s211_s11 = scalar_lea.sflag [#allocation3], %s896_s28  ;;  %s915_s9 = int_to_ptr.vmem [resolvable:$true] %s227_s9 }
  0x13   : > { %s700_s12 = scalar_lea.hbm %s905_s7, 128  ;;  %p702_p13 = pneg %p911_p9 }
  0x14   : > { %p701_p12 = scmp.ne.s32.totalorder %s905_s7, %s700_s12  ;;  %s705_s15 = scalar_lea.hbm %s1033_s0, 256 }
  0x15   : > { %p706_p2 = scmp.lt.u32.totalorder %s905_s7, %s1033_s0  ;;  %p707_p3 = scmp.lt.u32.totalorder %s705_s15, %s700_s12 }
  0x16   : > { %p703_p0 = pnand %p702_p13, %p701_p12  ;;  %p709_p5 = scmp.lt.u32.totalorder %s700_s12, %s905_s7 }
  0x17   : > { %p708_p4 = por %p707_p3, %p706_p2 }
  0x18   : > { %p704_p1 = pneg %p703_p0 }
  0x19   : > { %p710_p6 = por %p709_p5, %p708_p4 }
  0x1b   : > { %p711_p8 = pnand %p710_p6, %p704_p1 }
  0x1d   : > { %714 = shalt.err (!%p711_p8)
}
  0x1e   : > { %s715_s24 = scalar_lea.vmem %s915_s9, 128  ;;  %s816_s25 = smov [#allocation2]  }
  0x1f   : > { %p716_p12 = scmp.ne.s32.totalorder %s915_s9, %s715_s24  ;;  %s720_s5 = sshll.u32 %s816_s25, 4  ;;  %s721_s5 = int_to_ptr.vmem [resolvable:$false] %s720_s5 }
  0x20   : > { %s722_s6 = scalar_lea.vmem %s721_s5, 256  ;;  %p723_p11 = scmp.lt.s32.totalorder %s915_s9, %s721_s5 }
  0x21   : > { %p718_p0 = pnand %p716_p12, %p702_p13  ;;  %p724_p2 = scmp.lt.s32.totalorder %s722_s6, %s715_s24 }
  0x23   : > { %p719_p10 = pneg %p718_p0  ;;  %p725_p3 = por %p724_p2, %p723_p11 }
  0x25   : > { %p726_p4 = pnand %p725_p3, %p719_p10 }
  0x27   : > { %729 = shalt.err (!%p726_p4)
}
  0x28   : > { %646 = dma.hbm_to_vmem [thread:$0]  (!%p911_p9), %s905_s7, 128, %s915_s9, %s211_s11  }
  0x29   : > { %p1042_p1 = scmp.lt.s32.totalorder %s814_s20, 3  ;;  %p1043_p5 = scmp.ge.s32.totalorder %s814_s20, 1 }
  0x2a   : > { %s958_s14 = scalar_lea.hbm %s1034_s1, %s637_s29  ;;  %s238_s15 = scalar_lea.vmem [#allocation4], %s623_s30 }
  0x2b   : > { %p949_p6 = pnand %p1043_p5, %p1042_p1  ;;  %s251_s21 = sshll.u32 %s238_s15, 4  ;;  %s252_s21 = int_to_ptr.vmem [resolvable:$true] %s251_s21 }
  0x2c   : > { %s235_s7 = scalar_lea.sflag [#allocation5], %s896_s28  ;;  %s730_s9 = scalar_lea.hbm %s958_s14, 128 }
  0x2d   : > { %s1044_s8 = scalar_select %p949_p6, 1, 0 }
  0x2e   : > { %p731_p10 = scmp.ne.s32.totalorder %s958_s14, %s730_s9  ;;  %s735_s29 = scalar_lea.hbm %s1034_s1, 256 }
  0x2f   : > { %p736_p12 = scmp.lt.u32.totalorder %s958_s14, %s1034_s1  ;;  %p737_p0 = scmp.lt.u32.totalorder %s735_s29, %s730_s9 }
  0x30   : > { %p733_p11 = pnand %p731_p10, %p702_p13  ;;  %p739_p3 = scmp.lt.u32.totalorder %s730_s9, %s958_s14 }
  0x31   : > { %p738_p2 = por %p737_p0, %p736_p12 }
  0x32   : > { %p734_p8 = pneg %p733_p11 }
  0x33   : > { %p740_p4 = por %p739_p3, %p738_p2 }
  0x35   : > { %p741_p1 = pnand %p740_p4, %p734_p8 }
  0x37   : > { %744 = shalt.err (!%p741_p1)
}
  0x38   : > { %s745_s28 = scalar_lea.vmem %s252_s21, 128  ;;  %s817_s30 = smov [#allocation4]  }
  0x39   : > { %p746_p5 = scmp.ne.s32.totalorder %s252_s21, %s745_s28  ;;  %s750_s5 = sshll.u32 %s817_s30, 4  ;;  %s751_s5 = int_to_ptr.vmem [resolvable:$false] %s750_s5 }
  0x3a   : > { %s752_s6 = scalar_lea.vmem %s751_s5, 256  ;;  %p753_p7 = scmp.lt.s32.totalorder %s252_s21, %s751_s5 }
  0x3b   : > { %p748_p10 = pnand %p746_p5, %p702_p13  ;;  %p754_p6 = scmp.lt.s32.totalorder %s752_s6, %s745_s28 }
  0x3d   : > { %p749_p11 = pneg %p748_p10  ;;  %p755_p0 = por %p754_p6, %p753_p7 }
  0x3f   : > { %p756_p12 = pnand %p755_p0, %p749_p11 }
  0x41   : > { %759 = shalt.err (!%p756_p12)
}
  0x42   : > { %649 = dma.hbm_to_vmem [thread:$0]  (!%p911_p9), %s958_s14, 128, %s252_s21, %s235_s7  }
  0x43   : > { %p1045_p8 = scmp.ne.s32.totalorder %s1044_s8, 0 }
  0x44   : > { %s262_s12 = sand.u32 (!%p1045_p8), 1, %s798_s16   ;;  %p1046_p13 = scmp.ne.s32.totalorder (!%p1045_p8), %s1040_s26, 0 }
  0x45   : > { %260 = sbr.rel (%p1045_p8) target bundleno = 236 (0xec), region = 28  ;;  %s630_s13 = sshll.u32 (!%p1045_p8), %s262_s12, 3 }
  0x46   : > { %s263_s15 = scalar_lea.sflag (!%p1045_p8), [#allocation3], %s262_s12  ;;  %s266_s9 = scalar_lea.vmem (!%p1045_p8), [#allocation2], %s630_s13 }
  0x4c   : > { %785 = dma.done.wait (%p1046_p13), %s263_s15, 128  }
  0x4d   : > { %787 = vsyncadd (%p1046_p13), %s263_s15, 4294967168  ;;  %s272_s11 = scalar_lea.sflag [#allocation5], %s262_s12  ;;  %s275_s23 = scalar_lea.vmem [#allocation4], %s630_s13 }
  0x4e   : > { %789 = dma.done.wait (%p1046_p13), %s272_s11, 128  }
  0x4f   : > { %791 = vsyncadd (%p1046_p13), %s272_s11, 4294967168  ;;  %p334_p7 = scmp.lt.s32.totalorder %s806_s18, 1  ;;  %vm360_vm0 = vcmask 3072   ;;  %v818_v0 = vmov 0.0   ;;  %v364_v1 = vld [vmem:[%s266_s9] sm:$0xff]  ;;  %v365_v2 = vld [vmem:[%s275_s23] sm:$0xff] }
  0x50   : > { %vm371_vm1 = vcmask 1043456   ;;  %v367_v3 = vmul.f32 %v365_v2, %v364_v1  ;;  %v393_v4 = vmul.f32 %v365_v2, %v365_v2  ;;  %v381_v5 = vmul.f32 %v364_v1, %v364_v1 }
  0x51   : > { %s1055_s18 = smov (!%p334_p7, %s806_s18), 1 }
  0x52   : > { %s632_s10 = sshll.u32 %s1055_s18, 2  ;;  %v369_v6 = vcombine.high %v367_v3, %v367_v3  ;;  %v372_v7 = vsel %vm371_vm1, %v367_v3, 0.0  ;;  %v395_v8 = vcombine.high %v393_v4, %v393_v4  ;;  %v397_v9 = vsel %vm371_vm1, %v393_v4, 0.0 }
  0x53   : > { %s998_s21 = scalar_lea.vmem %s1035_s2, %s632_s10  ;;  %v383_v10 = vcombine.high %v381_v5, %v381_v5  ;;  %v385_v13 = vsel %vm371_vm1, %v381_v5, 0.0  ;;  %s355_s7 = scalar_lea.vmem %s1037_s4, %s632_s10 }
  0x54   : > { %361 = vst.msk [vmem:[%s998_s21] sm:$0xf] %vm360_vm0, %v818_v0  ;;  %v373_v11 = vsel %vm371_vm1, %v369_v6, 0.0  ;;  %v398_v12 = vsel %vm371_vm1, %v395_v8, 0.0  ;;  %s347_s25 = scalar_lea.vmem %s1036_s3, %s632_s10  ;;  %363 = vst.msk [vmem:[%s355_s7] sm:$0xf] %vm360_vm0, %v818_v0 }
  0x55   : > { %v374_v14 = vadd.f32 %v373_v11, %v372_v7  ;;  %v399_v15 = vadd.f32 %v398_v12, %v397_v9  ;;  %v386_v16 = vsel %vm371_vm1, %v383_v10, 0.0  ;;  %362 = vst.msk [vmem:[%s347_s25] sm:$0xf] %vm360_vm0, %v818_v0 }
  0x56   : > { %v387_v17 = vadd.f32 %v386_v16, %v385_v13 }
  0x57   : > { %375 = vadd.xlane.f32.xlu0 %v374_v14  ;;  %400 = vadd.xlane.f32.xlu1 %v399_v15 }
  0x5b   : > { %388 = vadd.xlane.f32.xlu0 %v387_v17  ;;  %v366_v18 = vld [vmem:[%s998_s21] sm:$0xf] }
  0x5c   : > { %v392_v19 = vld [vmem:[%s355_s7] sm:$0xf] }
  0x5d   : > { %v380_v24 = vld [vmem:[%s347_s25] sm:$0xf] }
  0xe4   : > { %v376_v20 = vpop.xlane.xlu0 %375  ;;  %v401_v21 = vpop.xlane.xlu1 %400 }
  0xe5   : > { %v377_v22 = vadd.f32 %v376_v20, %v366_v18  ;;  %v402_v23 = vadd.f32 %v401_v21, %v392_v19 }
  0xe7   : > { %379 = vst.msk [vmem:[%s998_s21] sm:$0xf] %vm360_vm0, %v377_v22  ;;  %403 = vst.msk [vmem:[%s355_s7] sm:$0xf] %vm360_vm0, %v402_v23 }
  0xe8   : > { %v389_v25 = vpop.xlane.xlu0 %388 }
  0xe9   : > { %v390_v26 = vadd.f32 %v389_v25, %v380_v24 }
  0xeb   : > { %391 = vst.msk [vmem:[%s347_s25] sm:$0xf] %vm360_vm0, %v390_v26 }
  0xec PF: > { %s21_s20 = sadd.s32 1, %s814_s20   ;;  %s1047_s15 = smov %s798_s16 }
  0xed   : > { %p18_p9 = scmp.ge.s32.totalorder %s21_s20, 4   ;;  %s1048_s16 = smov %s802_s17 }
  0xee   : > { %s1049_s17 = smov %s893_s27  ;;  %s1050_s18 = smov %s810_s19 }
  0xef   : > { %s1051_s19 = smov %s1053_s22  ;;  %20 = sbr.rel (!%p18_p9) target bundleno = 6 (0x6), region = 109 }
  0xf6   :  { %475 = vsyncpa [#allocation3], 1 }
  0xf7   :  { %477 = vsyncpa [#allocation3 + $0x1], 1 }
  0xf8   :  { %478 = vsyncpa [#allocation5], 1 }
  0xf9   :  { %480 = vsyncpa [#allocation5 + $0x1], 1 }

</bundles_post_ra>
